<compile_context>
chip_gen: v7x
topology: tpu7x:2x2x1
jax: 0.10.0
libtpu: 0.0.40
codegen_flags: <defaults>
</compile_context>

<pallas_src>
import functools

import jax
import jax.numpy as jnp
import numpy as np
from jax.experimental import pallas as pl
from jax.experimental.pallas import tpu as pltpu


def _identity_kernel(x_ref, o_ref, flag_ref):
    # Output aliases the input, so there is nothing to copy.  Write a single
    # SMEM word so the kernel body is non-empty and trivially lowerable; the
    # HBM refs are intentionally untouched (zero DMA, zero HBM traffic).
    del x_ref, o_ref
    flag_ref[0] = jnp.int32(1)


@functools.partial(jax.jit, donate_argnums=(0,))
def _identity_pallas(x):
    return pl.pallas_call(
        _identity_kernel,
        out_shape=jax.ShapeDtypeStruct(x.shape, x.dtype),
        in_specs=[pl.BlockSpec(memory_space=pl.ANY)],   # leave x in HBM, no auto-DMA
        out_specs=pl.BlockSpec(memory_space=pl.ANY),    # output stays in HBM too
        scratch_shapes=[pltpu.SMEM((1,), jnp.int32)],
        input_output_aliases={0: 0},                    # output buffer == input buffer
        compiler_params=pltpu.CompilerParams(has_side_effects=True),
    )(x)


def identity_norm(x):
    """Pallas implementation of IdentityNorm.forward: y = x.

    NOTE: the input buffer is donated (the result aliases it); do not read
    `x` after calling this function.
    """
    if x.ndim == 0 or x.size == 0:
        # Nothing to launch a kernel for; identity is identity.
        return x
    return _identity_pallas(x)


if __name__ == "__main__":
    key = jax.random.PRNGKey(0)
    # Small shape consistent with a norm-layer input: (batch=2, seq=8, hidden=32)
    x = jax.random.normal(key, (2, 8, 32), dtype=jnp.float32)

    # Keep a host copy for verification: the kernel donates/aliases x's buffer,
    # so x itself must not be read after the call.
    x_host = jax.device_get(x)

    y = identity_norm(x)
    y = jax.block_until_ready(y)

    assert y.shape == x_host.shape and y.dtype == x_host.dtype
    assert np.array_equal(jax.device_get(y), x_host)
    print("KERNEL_OK")
</pallas_src>

<mosaic_0001>
module attributes {stable_mosaic.version = 11 : i64} {
  func.func @_identity_kernel(%arg0: memref<2x8x32xf32, #tpu.memory_space<any>>, %arg1: memref<2x8x32xf32, #tpu.memory_space<any>>, %arg2: memref<1xi32, #tpu.memory_space<smem>>) attributes {dimension_semantics = [], scalar_prefetch = 0 : i64, scratch_operands = 1 : i64, tpu.core_type = #tpu.core_type<tc>} {
    %c1_i32 = arith.constant 1 : i32
    %c0 = arith.constant 0 : index
    %0 = memref.load %arg2[%c0] : memref<1xi32, #tpu.memory_space<smem>>
    memref.store %c1_i32, %arg2[%c0] : memref<1xi32, #tpu.memory_space<smem>>
    return
  }
}

</mosaic_0001>

<bundles_post_ra>
// kernel: _identity_pallas.1
= control target key start
LH: loop header
LB: loop body
LE: loop exit
PB: predicated region body
PF: predicated region fallthrough
CT: control target
= control target key end

     0   :  { %s18_s0 = inlined_call_operand.hbm [shape: f32[2,8,32], index: 0, kind: input, shape index: {}, may-alias: {0,1}]   ;;  %s19_s1 = inlined_call_operand.hbm [shape: f32[2,8,32], index: 1, kind: output, shape index: {}, may-alias: {0,1}]  }

</bundles_post_ra>
